<compile_context>
chip_gen: v5e
topology: v5e:2x2
jax: 0.10.0
libtpu: 0.0.40
codegen_flags: <defaults>
</compile_context>

<pallas_src>
import jax
import jax.numpy as jnp
from jax import lax
from jax.experimental import pallas as pl
from jax.experimental.pallas import tpu as pltpu


E_TILE = 128  # edges per grid step (lane width of the dst row / one-hot tiles)


def _round_up(v, m):
    return (v + m - 1) // m * m


def _pad2d(a, rows, cols):
    return jnp.pad(a, ((0, rows - a.shape[0]), (0, cols - a.shape[1])))


def gin_block_kernel(x_ref, ea_ref, src_ref, dst_ref,
                     w1_ref, b1_ref, w2_ref, b2_ref,
                     out_ref,                      # VMEM output (N_pad, D_pad)
                     acc_ref):                     # VMEM scratch accumulator
    k = pl.program_id(0)
    n_pad = acc_ref.shape[0]
    e_tile = ea_ref.shape[0]

    # --- init accumulator on the first edge tile ---
    @pl.when(k == 0)
    def _():
        acc_ref[...] = jnp.zeros_like(acc_ref)

    # --- gather on the MXU: msgs[e] = x[src[e]] + edge_attr[e] ---
    src_col = src_ref[...]                                             # (E_TILE, 1) int32
    node_iota_l = lax.broadcasted_iota(jnp.int32, (e_tile, n_pad), 1)  # lanes = nodes
    src_onehot = (src_col == node_iota_l).astype(jnp.float32)          # (E_TILE, N_pad)
    msgs = jnp.dot(src_onehot, x_ref[...],
                   preferred_element_type=jnp.float32) + ea_ref[...]   # (E_TILE, D_pad)

    # --- scatter-add on the MXU: acc[n] += sum_{dst[e]==n} msgs[e] ---
    dst_row = dst_ref[...]                                             # (1, E_TILE) int32
    node_iota_s = lax.broadcasted_iota(jnp.int32, (n_pad, e_tile), 0)  # sublanes = nodes
    dst_onehot = (dst_row == node_iota_s).astype(jnp.float32)          # (N_pad, E_TILE)
    acc_ref[...] += jnp.dot(dst_onehot, msgs,
                            preferred_element_type=jnp.float32)

    # --- finalize on the last edge tile: GIN update + MLP ---
    @pl.when(k == pl.num_programs(0) - 1)
    def _():
        h = x_ref[...] + acc_ref[...]                                  # (1+eps)*x + aggr
        h1 = jnp.dot(h, w1_ref[...],
                     preferred_element_type=jnp.float32) + b1_ref[...]
        h1 = jnp.maximum(h1, 0.0)
        out = jnp.dot(h1, w2_ref[...],
                      preferred_element_type=jnp.float32) + b2_ref[...]
        out_ref[...] = out.astype(out_ref.dtype)


def block2d_forward(x, edge_index, edge_attr, params):
    """x: (N, D) f32, edge_index: (2, E) int32, edge_attr: (E, D) f32."""
    N, D = x.shape
    E = edge_index.shape[1]
    w1, b1, w2, b2 = params
    H = w1.shape[1]

    # Lane-dense / tile-friendly padding.
    D_pad = _round_up(D, 128)
    H_pad = _round_up(H, 128)
    N_pad = _round_up(N, 8)
    E_pad = _round_up(E, E_TILE)

    x_p = _pad2d(x.astype(jnp.float32), N_pad, D_pad)
    ea_p = _pad2d(edge_attr.astype(jnp.float32), E_pad, D_pad)
    w1_p = _pad2d(w1.astype(jnp.float32), D_pad, H_pad)
    b1_p = _pad2d(b1.reshape(1, -1).astype(jnp.float32), 1, H_pad)
    w2_p = _pad2d(w2.astype(jnp.float32), H_pad, D_pad)
    b2_p = _pad2d(b2.reshape(1, -1).astype(jnp.float32), 1, D_pad)

    src = edge_index[0].astype(jnp.int32)
    dst = edge_index[1].astype(jnp.int32)
    # Padded edges carry the sentinel index N_pad: never matches iota 0..N_pad-1,
    # so their one-hot rows/cols are all-zero and they contribute nothing.
    src_p = jnp.pad(src, (0, E_pad - E), constant_values=N_pad).reshape(E_pad, 1)
    dst_p = jnp.pad(dst, (0, E_pad - E), constant_values=N_pad).reshape(1, E_pad)

    grid = (E_pad // E_TILE,)

    grid_spec = pltpu.PrefetchScalarGridSpec(
        num_scalar_prefetch=0,
        grid=grid,
        in_specs=[
            pl.BlockSpec((N_pad, D_pad), lambda k: (0, 0)),    # x (resident)
            pl.BlockSpec((E_TILE, D_pad), lambda k: (k, 0)),   # edge_attr tile
            pl.BlockSpec((E_TILE, 1), lambda k: (k, 0)),       # src tile (column)
            pl.BlockSpec((1, E_TILE), lambda k: (0, k)),       # dst tile (lane-major)
            pl.BlockSpec((D_pad, H_pad), lambda k: (0, 0)),    # W1
            pl.BlockSpec((1, H_pad), lambda k: (0, 0)),        # b1
            pl.BlockSpec((H_pad, D_pad), lambda k: (0, 0)),    # W2
            pl.BlockSpec((1, D_pad), lambda k: (0, 0)),        # b2
        ],
        out_specs=pl.BlockSpec((N_pad, D_pad), lambda k: (0, 0)),
        scratch_shapes=[
            pltpu.VMEM((N_pad, D_pad), jnp.float32),           # aggregation accumulator
        ],
    )

    out_p = pl.pallas_call(
        gin_block_kernel,
        out_shape=jax.ShapeDtypeStruct((N_pad, D_pad), jnp.float32),
        grid_spec=grid_spec,
        compiler_params=pltpu.CompilerParams(
            dimension_semantics=("arbitrary",),                # edge axis is a reduction
            vmem_limit_bytes=48 * 1024 * 1024,
        ),
    )(x_p, ea_p, src_p, dst_p, w1_p, b1_p, w2_p, b2_p)

    return out_p[:N, :D]


def reference_forward(x, edge_index, edge_attr, params):
    w1, b1, w2, b2 = params
    src = edge_index[0]
    dst = edge_index[1]
    msgs = x[src] + edge_attr
    aggr = jnp.zeros_like(x).at[dst].add(msgs)
    h = x + aggr
    h1 = jnp.maximum(h @ w1 + b1, 0.0)
    return h1 @ w2 + b2


def glorot_uniform(key, shape):
    fan_in, fan_out = shape[0], shape[1]
    limit = (6.0 / (fan_in + fan_out)) ** 0.5
    return jax.random.uniform(key, shape, jnp.float32, -limit, limit)


if __name__ == "__main__":
    key = jax.random.PRNGKey(0)
    emb_dim = 32            # args.emb_dim
    num_nodes = 24
    num_edges = 200         # > E_TILE so the multi-tile accumulation path runs

    k_x, k_ea, k_src, k_dst, k_w1, k_w2 = jax.random.split(key, 6)
    x = jax.random.normal(k_x, (num_nodes, emb_dim), jnp.float32)
    edge_attr = jax.random.normal(k_ea, (num_edges, emb_dim), jnp.float32)
    src = jax.random.randint(k_src, (num_edges,), 0, num_nodes, jnp.int32)
    dst = jax.random.randint(k_dst, (num_edges,), 0, num_nodes, jnp.int32)
    edge_index = jnp.stack([src, dst], axis=0)              # (2, E)

    # GIN MLP parameters: Linear(D, 2D) -> ReLU -> Linear(2D, D)
    w1 = glorot_uniform(k_w1, (emb_dim, 2 * emb_dim))
    b1 = jnp.zeros((2 * emb_dim,), jnp.float32)
    w2 = glorot_uniform(k_w2, (2 * emb_dim, emb_dim))
    b2 = jnp.zeros((emb_dim,), jnp.float32)
    params = (w1, b1, w2, b2)

    out = block2d_forward(x, edge_index, edge_attr, params)
    out = jax.block_until_ready(out)

    ref = reference_forward(x, edge_index, edge_attr, params)
    assert out.shape == (num_nodes, emb_dim)
    assert jnp.allclose(out, ref, atol=1e-3, rtol=1e-3), "mismatch vs reference"
    print("KERNEL_OK")
</pallas_src>

<mosaic_0001>
module attributes {stable_mosaic.version = 11 : i64} {
  func.func @gin_block_kernel(%arg0: i32, %arg1: memref<24x128xf32, #tpu.memory_space<vmem>>, %arg2: memref<128x128xf32, #tpu.memory_space<vmem>>, %arg3: memref<128x1xi32, #tpu.memory_space<vmem>>, %arg4: memref<1x128xi32, #tpu.memory_space<vmem>>, %arg5: memref<128x128xf32, #tpu.memory_space<vmem>>, %arg6: memref<1x128xf32, #tpu.memory_space<vmem>>, %arg7: memref<128x128xf32, #tpu.memory_space<vmem>>, %arg8: memref<1x128xf32, #tpu.memory_space<vmem>>, %arg9: memref<24x128xf32, #tpu.memory_space<vmem>>, %arg10: memref<24x128xf32, #tpu.memory_space<vmem>>) attributes {dimension_semantics = [#tpu.dimension_semantics<arbitrary>], iteration_bounds = array<i64: 2>, scalar_prefetch = 0 : i64, scratch_operands = 1 : i64, tpu.core_type = #tpu.core_type<tc>, window_params = [{pipeline_mode = #tpu.pipeline_mode<synchronous>, transform_indices = @transform_0, window_bounds = array<i64: 24, 128>}, {transform_indices = @transform_1, window_bounds = array<i64: 128, 128>}, {transform_indices = @transform_2, window_bounds = array<i64: 128, 1>}, {transform_indices = @transform_3, window_bounds = array<i64: 1, 128>}, {pipeline_mode = #tpu.pipeline_mode<synchronous>, transform_indices = @transform_4, window_bounds = array<i64: 128, 128>}, {pipeline_mode = #tpu.pipeline_mode<synchronous>, transform_indices = @transform_5, window_bounds = array<i64: 1, 128>}, {pipeline_mode = #tpu.pipeline_mode<synchronous>, transform_indices = @transform_6, window_bounds = array<i64: 128, 128>}, {pipeline_mode = #tpu.pipeline_mode<synchronous>, transform_indices = @transform_7, window_bounds = array<i64: 1, 128>}, {pipeline_mode = #tpu.pipeline_mode<synchronous>, transform_indices = @transform_8, window_bounds = array<i64: 24, 128>}]} {
    %c0_i32 = arith.constant 0 : i32
    %0 = arith.cmpi eq, %arg0, %c0_i32 : i32
    %1 = arith.extui %0 : i1 to i32
    %c0_i32_0 = arith.constant 0 : i32
    %2 = arith.cmpi ne, %1, %c0_i32_0 : i32
    scf.if %2 {
      %cst_14 = arith.constant 0.000000e+00 : f32
      %26 = vector.broadcast %cst_14 : f32 to vector<24x128xf32>
      %c0_15 = arith.constant 0 : index
      %c0_16 = arith.constant 0 : index
      %27 = vector.load %arg10[%c0_15, %c0_16] : memref<24x128xf32, #tpu.memory_space<vmem>>, vector<24x128xf32>
      tpu.vector_store %arg10[%c0_15, %c0_16], %26 {strides = array<i32>} : memref<24x128xf32, #tpu.memory_space<vmem>>, vector<24x128xf32>,
    } else {
    }
    %c0 = arith.constant 0 : index
    %c0_1 = arith.constant 0 : index
    %3 = vector.load %arg3[%c0, %c0_1] : memref<128x1xi32, #tpu.memory_space<vmem>>, vector<128x1xi32>
    %4 = tpu.iota {dimensions = array<i32: 1>} : vector<128x24xi32>
    %5 = vector.broadcast %3 : vector<128x1xi32> to vector<128x24xi32>
    %6 = arith.cmpi eq, %5, %4 : vector<128x24xi32>
    %7 = arith.extui %6 : vector<128x24xi1> to vector<128x24xi32>
    %8 = arith.sitofp %7 : vector<128x24xi32> to vector<128x24xf32>
    %c0_2 = arith.constant 0 : index
    %c0_3 = arith.constant 0 : index
    %9 = vector.load %arg1[%c0_2, %c0_3] : memref<24x128xf32, #tpu.memory_space<vmem>>, vector<24x128xf32>
    %cst = arith.constant dense<0.000000e+00> : vector<128x128xf32>
    %10 = tpu.matmul %8, %9, %cst {dimension_numbers = #tpu.dot_dimension_numbers<[1], [0], [0], [1], [0, 0, 1, 1], [], []>} : vector<128x24xf32>, vector<24x128xf32>, vector<128x128xf32> -> vector<128x128xf32>
    %c0_4 = arith.constant 0 : index
    %c0_5 = arith.constant 0 : index
    %11 = vector.load %arg2[%c0_4, %c0_5] : memref<128x128xf32, #tpu.memory_space<vmem>>, vector<128x128xf32>
    %12 = arith.addf %10, %11 : vector<128x128xf32>
    %c0_6 = arith.constant 0 : index
    %c0_7 = arith.constant 0 : index
    %13 = vector.load %arg4[%c0_6, %c0_7] : memref<1x128xi32, #tpu.memory_space<vmem>>, vector<1x128xi32>
    %14 = tpu.iota {dimensions = array<i32: 0>} : vector<24x128xi32>
    %15 = vector.broadcast %13 : vector<1x128xi32> to vector<24x128xi32>
    %16 = arith.cmpi eq, %15, %14 : vector<24x128xi32>
    %17 = arith.extui %16 : vector<24x128xi1> to vector<24x128xi32>
    %18 = arith.sitofp %17 : vector<24x128xi32> to vector<24x128xf32>
    %c0_8 = arith.constant 0 : index
    %c0_9 = arith.constant 0 : index
    %19 = vector.load %arg10[%c0_8, %c0_9] : memref<24x128xf32, #tpu.memory_space<vmem>>, vector<24x128xf32>
    %cst_10 = arith.constant dense<0.000000e+00> : vector<24x128xf32>
    %20 = tpu.matmul %18, %12, %cst_10 {dimension_numbers = #tpu.dot_dimension_numbers<[1], [0], [0], [1], [0, 0, 1, 1], [], []>} : vector<24x128xf32>, vector<128x128xf32>, vector<24x128xf32> -> vector<24x128xf32>
    %21 = arith.addf %19, %20 : vector<24x128xf32>
    %c0_11 = arith.constant 0 : index
    %c0_12 = arith.constant 0 : index
    %22 = vector.load %arg10[%c0_11, %c0_12] : memref<24x128xf32, #tpu.memory_space<vmem>>, vector<24x128xf32>
    tpu.vector_store %arg10[%c0_11, %c0_12], %21 {strides = array<i32>} : memref<24x128xf32, #tpu.memory_space<vmem>>, vector<24x128xf32>,
    %c1_i32 = arith.constant 1 : i32
    %23 = arith.cmpi eq, %arg0, %c1_i32 : i32
    %24 = arith.extui %23 : i1 to i32
    %c0_i32_13 = arith.constant 0 : i32
    %25 = arith.cmpi ne, %24, %c0_i32_13 : i32
    scf.if %25 {
      %c0_14 = arith.constant 0 : index
      %c0_15 = arith.constant 0 : index
      %26 = vector.load %arg1[%c0_14, %c0_15] : memref<24x128xf32, #tpu.memory_space<vmem>>, vector<24x128xf32>
      %c0_16 = arith.constant 0 : index
      %c0_17 = arith.constant 0 : index
      %27 = vector.load %arg10[%c0_16, %c0_17] : memref<24x128xf32, #tpu.memory_space<vmem>>, vector<24x128xf32>
      %28 = arith.addf %26, %27 : vector<24x128xf32>
      %c0_18 = arith.constant 0 : index
      %c0_19 = arith.constant 0 : index
      %29 = vector.load %arg5[%c0_18, %c0_19] : memref<128x128xf32, #tpu.memory_space<vmem>>, vector<128x128xf32>
      %cst_20 = arith.constant dense<0.000000e+00> : vector<24x128xf32>
      %30 = tpu.matmul %28, %29, %cst_20 {dimension_numbers = #tpu.dot_dimension_numbers<[1], [0], [0], [1], [0, 0, 1, 1], [], []>} : vector<24x128xf32>, vector<128x128xf32>, vector<24x128xf32> -> vector<24x128xf32>
      %c0_21 = arith.constant 0 : index
      %c0_22 = arith.constant 0 : index
      %31 = vector.load %arg6[%c0_21, %c0_22] : memref<1x128xf32, #tpu.memory_space<vmem>>, vector<1x128xf32>
      %32 = vector.broadcast %31 : vector<1x128xf32> to vector<24x128xf32>
      %33 = arith.addf %30, %32 : vector<24x128xf32>
      %cst_23 = arith.constant 0.000000e+00 : f32
      %34 = vector.broadcast %cst_23 : f32 to vector<24x128xf32>
      %35 = arith.maximumf %33, %34 : vector<24x128xf32>
      %c0_24 = arith.constant 0 : index
      %c0_25 = arith.constant 0 : index
      %36 = vector.load %arg7[%c0_24, %c0_25] : memref<128x128xf32, #tpu.memory_space<vmem>>, vector<128x128xf32>
      %cst_26 = arith.constant dense<0.000000e+00> : vector<24x128xf32>
      %37 = tpu.matmul %35, %36, %cst_26 {dimension_numbers = #tpu.dot_dimension_numbers<[1], [0], [0], [1], [0, 0, 1, 1], [], []>} : vector<24x128xf32>, vector<128x128xf32>, vector<24x128xf32> -> vector<24x128xf32>
      %c0_27 = arith.constant 0 : index
      %c0_28 = arith.constant 0 : index
      %38 = vector.load %arg8[%c0_27, %c0_28] : memref<1x128xf32, #tpu.memory_space<vmem>>, vector<1x128xf32>
      %39 = vector.broadcast %38 : vector<1x128xf32> to vector<24x128xf32>
      %40 = arith.addf %37, %39 : vector<24x128xf32>
      %c0_29 = arith.constant 0 : index
      %c0_30 = arith.constant 0 : index
      %41 = vector.load %arg9[%c0_29, %c0_30] : memref<24x128xf32, #tpu.memory_space<vmem>>, vector<24x128xf32>
      tpu.vector_store %arg9[%c0_29, %c0_30], %40 {strides = array<i32>} : memref<24x128xf32, #tpu.memory_space<vmem>>, vector<24x128xf32>,
    } else {
    }
    return
  }
  func.func @transform_0(%arg0: i32) -> (i32, i32) {
    %c0_i32 = arith.constant 0 : i32
    %c0_i32_0 = arith.constant 0 : i32
    %c0_i32_1 = arith.constant 0 : i32
    return %c0_i32, %c0_i32_0 : i32, i32
  }
  func.func @transform_1(%arg0: i32) -> (i32, i32) {
    %c0_i32 = arith.constant 0 : i32
    %c0_i32_0 = arith.constant 0 : i32
    return %arg0, %c0_i32 : i32, i32
  }
  func.func @transform_2(%arg0: i32) -> (i32, i32) {
    %c0_i32 = arith.constant 0 : i32
    %c0_i32_0 = arith.constant 0 : i32
    return %arg0, %c0_i32 : i32, i32
  }
  func.func @transform_3(%arg0: i32) -> (i32, i32) {
    %c0_i32 = arith.constant 0 : i32
    %c0_i32_0 = arith.constant 0 : i32
    return %c0_i32, %arg0 : i32, i32
  }
  func.func @transform_4(%arg0: i32) -> (i32, i32) {
    %c0_i32 = arith.constant 0 : i32
    %c0_i32_0 = arith.constant 0 : i32
    %c0_i32_1 = arith.constant 0 : i32
    return %c0_i32, %c0_i32_0 : i32, i32
  }
  func.func @transform_5(%arg0: i32) -> (i32, i32) {
    %c0_i32 = arith.constant 0 : i32
    %c0_i32_0 = arith.constant 0 : i32
    %c0_i32_1 = arith.constant 0 : i32
    return %c0_i32, %c0_i32_0 : i32, i32
  }
  func.func @transform_6(%arg0: i32) -> (i32, i32) {
    %c0_i32 = arith.constant 0 : i32
    %c0_i32_0 = arith.constant 0 : i32
    %c0_i32_1 = arith.constant 0 : i32
    return %c0_i32, %c0_i32_0 : i32, i32
  }
  func.func @transform_7(%arg0: i32) -> (i32, i32) {
    %c0_i32 = arith.constant 0 : i32
    %c0_i32_0 = arith.constant 0 : i32
    %c0_i32_1 = arith.constant 0 : i32
    return %c0_i32, %c0_i32_0 : i32, i32
  }
  func.func @transform_8(%arg0: i32) -> (i32, i32) {
    %c0_i32 = arith.constant 0 : i32
    %c0_i32_0 = arith.constant 0 : i32
    %c0_i32_1 = arith.constant 0 : i32
    return %c0_i32, %c0_i32_0 : i32, i32
  }
}

</mosaic_0001>

<bundles_post_ra>
// kernel: tpu_custom_call.1
= control target key start
LH: loop header
LB: loop body
LE: loop exit
PB: predicated region body
PF: predicated region fallthrough
CT: control target
= control target key end

     0   :  { %13 = vsyncpa [#allocation4], 0  ;;  %s1417_s0 = inlined_call_operand.hbm [shape: f32[24,128], index: 0, kind: input, shape index: {}]   ;;  %s1418_s1 = inlined_call_operand.vmem [shape: f32[256,128], index: 1, kind: input, shape index: {}]   ;;  %s1419_s2 = inlined_call_operand.vmem [shape: s32[256,1], index: 2, kind: input, shape index: {}]   ;;  %s1420_s3 = inlined_call_operand.vmem [shape: s32[1,256], index: 3, kind: input, shape index: {}]   ;;  %s1421_s4 = inlined_call_operand.hbm [shape: f32[128,128], index: 4, kind: input, shape index: {}]   ;;  %s1422_s5 = inlined_call_operand.vmem [shape: f32[1,128], index: 5, kind: input, shape index: {}]   ;;  %s1423_s6 = inlined_call_operand.hbm [shape: f32[128,128], index: 6, kind: input, shape index: {}]   ;;  %s1424_s7 = inlined_call_operand.vmem [shape: f32[1,128], index: 7, kind: input, shape index: {}]   ;;  %s1425_s8 = inlined_call_operand.hbm [shape: f32[24,128], index: 8, kind: output, shape index: {}]  }
   0x1   :  { %14 = vsyncpa [#allocation7], 0 }
   0x2   :  { %15 = vsyncpa [#allocation5], 0  ;;  %s1264_s27 = smov 0  }
   0x3 LB: > { %s1270_s28 = sadd.s32 4294967295, %s1205_s27   ;;  %p898_p0 = scmp.ge.s32.totalorder %s1205_s27, 1  ;;  %s1205_s27 = sphi %s1264_s27, %s21_s27  }
   0x4   : > { %p230_p1 = scmp.lt.s32.totalorder %s1205_s27, 3  ;;  %p899_p2 = scmp.ne.s32.totalorder %s1270_s28, 0 }
   0x5   : > { %p1035_p3 = scmp.eq.s32.totalorder %s1270_s28, 0  ;;  %s255_s9 = sshll.u32 %s1421_s4, 4  ;;  %s256_s9 = int_to_ptr.hbm [resolvable:$true] %s255_s9 }
   0x6   : > { %p1279_p4 = pnand %p898_p0, %p230_p1  ;;  %s241_s13 = sshll.u32 %s1417_s0, 4  ;;  %s242_s13 = int_to_ptr.hbm [resolvable:$true] %s241_s13 }
   0x7   : > { %s1207_s14 = smov [#allocation6]   ;;  %s1208_s16 = smov [#allocation3]  }
   0x8   : > { %p1025_p5 = pneg %p1279_p4  ;;  %s257_s15 = sshll.u32 %s1207_s14, 4  ;;  %s258_s15 = int_to_ptr.vmem [resolvable:$true] %s257_s15 }
   0x9   : > { %s243_s17 = sshll.u32 %s1208_s16, 4  ;;  %s272_s20 = sshll.u32 %s1423_s6, 4  ;;  %s244_s17 = int_to_ptr.vmem [resolvable:$true] %s243_s17  ;;  %s273_s20 = int_to_ptr.hbm [resolvable:$true] %s272_s20 }
   0xa   : > { %p1026_p6 = pnand %p1035_p3, %p1025_p5  ;;  %s1209_s21 = smov 128  }
   0xb   : > { %s1210_s22 = smov 8   ;;  %s1211_s23 = smov [#allocation8]  }
   0xc   : > { %1031 = dma.hbm_to_vmem [thread:$0]  (!%p1026_p6), %s256_s9, 2048, %s258_s15, [#allocation7], %s1209_s21, %s1209_s21, %s1210_s22  }
   0xd   : > { %1028 = dma.hbm_to_vmem [thread:$0]  (!%p1026_p6), %s242_s13, 384, %s244_s17, [#allocation4], %s1209_s21, %s1209_s21, %s1210_s22  }
   0xe   : > { %s274_s24 = sshll.u32 %s1211_s23, 4  ;;  %317 = sbr.rel (%p1279_p4) target bundleno = 808 (0x328), region = 52  ;;  %s275_s24 = int_to_ptr.vmem [resolvable:$true] %s274_s24 }
   0xf   : > { %1034 = dma.hbm_to_vmem [thread:$0]  (!%p1026_p6), %s273_s20, 2048, %s275_s24, [#allocation7], %s1209_s21, %s1209_s21, %s1210_s22  }
  0x13   : > { %1192 = dma.done.wait (%p1035_p3), [#allocation4], 384  }
  0x14   : > { %1194 = vsyncadd (%p1035_p3), [#allocation4], 4294966912 }
  0x15   : > { %1196 = dma.done.wait (%p1035_p3), [#allocation7], 4096  }
  0x16   : > { %1198 = vsyncadd (%p1035_p3), [#allocation7], 4294963200  ;;  %s907_s25 = sshll.u32 %s1270_s28, 4  ;;  %p377_p7 = scmp.lt.s32.totalorder %s1270_s28, 1 }
  0x17   : > { %p366_p8 = scmp.lt.s32.totalorder %s907_s25, 31  ;;  %383 = sbr.rel (%p899_p2) target bundleno = 32 (0x20), region = 68 }
  0x18   : > { %s1306_s26 = scalar_select %p377_p7, %s1270_s28, 1 }
  0x19   : > { %s1428_s25 = smov (!%p366_p8, %s907_s25), 31 }
  0x1a   : > { %s379_s9 = scalar_lea.vmem %s1420_s3, %s1306_s26  ;;  %s908_s10 = sshll.u32 %s1428_s25, 3 }
  0x1b   : > { %s1315_s13 = scalar_lea.vmem %s1418_s1, %s908_s10  ;;  %s1320_s16 = scalar_lea.vmem %s1419_s2, %s908_s10 }
  0x1c   : > { %v1212_v0 = vmov 0.0  }
  0x1d   : > { %384 = vst [vmem:[#allocation2 + $0x10] sm:$0xff] %v1212_v0 }
  0x1e   : > { %385 = vst [vmem:[#allocation2] sm:$0xff] %v1212_v0 }
  0x1f   : > { %386 = vst [vmem:[#allocation2 + $0x8] sm:$0xff] %v1212_v0 }
  0x20 PF: > { %v399_v1 = vld [vmem:[%s1320_s16 + $0x60] sm:$0xff]  ;;  %v393_v2 = vld [vmem:[%s1320_s16 + $0x30] sm:$0xff]  ;;  %v1213_v3 = vmov 0   ;;  %v400_v4 = vld [vmem:[%s1320_s16 + $0x68] sm:$0xff]  ;;  %v403_v22 = vlaneseq  ;;  %vm520_vm0 = vcmask 195584   ;;  %v1214_v25 = vmov 0.0  }
  0x21   : > { %1064 = vset.pattern.permute.xlu1 %v1213_v3  ;;  %1063 = vset.pattern.permute.xlu0 %v1213_v3  ;;  %v395_v5 = vld [vmem:[%s1320_s16 + $0x40] sm:$0xff]  ;;  %v394_v6 = vld [vmem:[%s1320_s16 + $0x38] sm:$0xff]  ;;  %v401_v8 = vld [vmem:[%s1320_s16 + $0x70] sm:$0xff]  ;;  %p950_p9 = scmp.ne.s32.totalorder %s1270_s28, 1 }
  0x22   : > { %442 = vperm.xlu1 %1064, %v399_v1   ;;  %424 = vperm.xlu0 %1063, %v393_v2   ;;  %v387_v7 = vld [vmem:[%s1320_s16] sm:$0xff]  ;;  %v396_v9 = vld [vmem:[%s1320_s16 + $0x48] sm:$0xff]  ;;  %v402_v11 = vld [vmem:[%s1320_s16 + $0x78] sm:$0xff]  ;;  %v1341_v23 = vand.u32 127, %v403_v22 }
  0x23   : > { %1065 = vset.pattern.permute.xlu2 %v1213_v3  ;;  %v388_v10 = vld [vmem:[%s1320_s16 + $0x8] sm:$0xff]  ;;  %v397_v12 = vld [vmem:[%s1320_s16 + $0x50] sm:$0xff]  ;;  %v398_v14 = vld [vmem:[%s1320_s16 + $0x58] sm:$0xff] }
  0x24   : > { %445 = vperm.xlu2 %1065, %v400_v4   ;;  %v389_v13 = vld [vmem:[%s1320_s16 + $0x10] sm:$0xff]  ;;  %v390_v15 = vld [vmem:[%s1320_s16 + $0x18] sm:$0xff]  ;;  %v391_v16 = vld [vmem:[%s1320_s16 + $0x20] sm:$0xff] }
  0x25   : > { %v392_v17 = vld [vmem:[%s1320_s16 + $0x28] sm:$0xff]  ;;  %v502_v19 = vld [vmem:[#allocation3 + $0x8] sm:$0xff]  ;;  %v501_v20 = vld [vmem:[#allocation3] sm:$0xff] }
  0x26   : > { %v503_v18 = vld [vmem:[#allocation3 + $0x10] sm:$0xff]  ;;  %v519_v1 = vld [vmem:[%s1315_s13 + $0x78] sm:$0xff]  ;;  %v518_v2 = vld [vmem:[%s1315_s13 + $0x70] sm:$0xff] }
  0x27   : > { %582 = vmatpush.msra.mxu0 %v503_v18  ;;  %955 = vmatpush.msra.mxu2 %v503_v18 }
  0x28   : > { %956 = vmatpush.msra.mxu3 %v503_v18  ;;  %v513_v18 = vld [vmem:[%s1315_s13 + $0x48] sm:$0xff] }
  0x29   : > { %583 = vmatpush.msra.mxu0 %v502_v19  ;;  %957 = vmatpush.msra.mxu2 %v502_v19 }
  0x2a   : > { %430 = vperm.xlu1 %1064, %v395_v5   ;;  %427 = vperm.xlu0 %1063, %v394_v6   ;;  %v517_v6 = vld [vmem:[%s1315_s13 + $0x68] sm:$0xff] }
  0x2b   : > { %958 = vmatpush.msra.mxu3 %v502_v19  ;;  %584 = vmatpush.msra.mxu0 %v501_v20 }
  0x2c   : > { %406 = vperm.xlu2 %1065, %v387_v7   ;;  %959 = vmatpush.msra.mxu2 %v501_v20 }
  0x2d   : > { %960 = vmatpush.msra.mxu3 %v501_v20  ;;  %v512_v20 = vld [vmem:[%s1315_s13 + $0x40] sm:$0xff] }
  0x32   : > { %448 = vperm.xlu1 %1064, %v401_v8   ;;  %433 = vperm.xlu0 %1063, %v396_v9   ;;  %v516_v8 = vld [vmem:[%s1315_s13 + $0x60] sm:$0xff] }
  0x34   : > { %409 = vperm.xlu2 %1065, %v388_v10  }
  0x3a   : > { %451 = vperm.xlu1 %1064, %v402_v11   ;;  %436 = vperm.xlu0 %1063, %v397_v12  }
  0x3c   : > { %412 = vperm.xlu2 %1065, %v389_v13   ;;  %v515_v13 = vld [vmem:[%s1315_s13 + $0x58] sm:$0xff] }
  0x42   : > { %439 = vperm.xlu0 %1063, %v398_v14   ;;  %415 = vperm.xlu1 %1064, %v390_v15   ;;  %v514_v14 = vld [vmem:[%s1315_s13 + $0x50] sm:$0xff] }
  0x44   : > { %418 = vperm.xlu2 %1065, %v391_v16  }
  0x4a   : > { %421 = vperm.xlu0 %1063, %v392_v17  }
  0x7e   : > { %v446_v21 = vpop.permute.xlu2 %445 }
  0x7f   : > { %vm466_vm6 = vcmp.eq.s32.totalorder %v446_v21, %v1341_v23 }
  0x80   : > { %v925_v35 = vsel %vm466_vm6, 1.0, %v1214_v25 }
  0x86   : > { %v407_v24 = vpop.permute.xlu2 %406 }
  0x87   : > { %vm453_vm1 = vcmp.eq.s32.totalorder %v407_v24, %v1341_v23 }
  0x88   : > { %v912_v26 = vsel %vm453_vm1, 1.0, %v1214_v25 }
  0x89   : > { %928 = vmatmul.msk.f32.vlgmr.msra.gmra.mxu0 %vm520_vm0, %v912_v26 }
  0x8e   : > { %v410_v27 = vpop.permute.xlu2 %409 }
  0x8f   : > { %vm454_vm2 = vcmp.eq.s32.totalorder %v410_v27, %v1341_v23  ;;  %v509_v27 = vld [vmem:[%s1315_s13 + $0x28] sm:$0xff] }
  0x90   : > { %v913_v28 = vsel %vm454_vm2, 1.0, %v1214_v25 }
  0x91   : > { %929 = vmatmul.msk.f32.gmra.mxu0 %vm520_vm0, %v913_v28 }
  0x94   : > { %v443_v29 = vpop.permute.xlu1 %442  ;;  %v425_v30 = vpop.permute.xlu0 %424 }
  0x95   : > { %vm465_vm3 = vcmp.eq.s32.totalorder %v443_v29, %v1341_v23  ;;  %vm459_vm4 = vcmp.eq.s32.totalorder %v425_v30, %v1341_v23  ;;  %v508_v30 = vld [vmem:[%s1315_s13 + $0x20] sm:$0xff] }
  0x96   : > { %v924_v31 = vsel %vm465_vm3, 1.0, %v1214_v25  ;;  %v918_v32 = vsel %vm459_vm4, 1.0, %v1214_v25  ;;  %v413_v33 = vpop.permute.xlu2 %412 }
  0x97   : > { %vm455_vm5 = vcmp.eq.s32.totalorder %v413_v33, %v1341_v23  ;;  %934 = vmatmul.msk.f32.vlgmr.msra.gmra.mxu2 %vm520_vm0, %v918_v32  ;;  %940 = vmatmul.msk.f32.vlgmr.msra.gmra.mxu3 %vm520_vm0, %v924_v31  ;;  %v507_v32 = vld [vmem:[%s1315_s13 + $0x18] sm:$0xff] }
  0x98   : > { %v914_v34 = vsel %vm455_vm5, 1.0, %v1214_v25 }
  0x99   : > { %930 = vmatmul.msk.f32.gmra.mxu0 %vm520_vm0, %v914_v34  ;;  %v636_v34 = vshrl.u32 %v403_v22, 7 }
  0x9c   : > { %v431_v36 = vpop.permute.xlu1 %430  ;;  %v428_v37 = vpop.permute.xlu0 %427 }
  0x9d   : > { %vm460_vm7 = vcmp.eq.s32.totalorder %v428_v37, %v1341_v23  ;;  %vm461_vm8 = vcmp.eq.s32.totalorder %v431_v36, %v1341_v23  ;;  %v505_v37 = vld [vmem:[%s1315_s13 + $0x8] sm:$0xff] }
  0x9e   : > { %v919_v38 = vsel %vm460_vm7, 1.0, %v1214_v25  ;;  %v920_v41 = vsel %vm461_vm8, 1.0, %v1214_v25  ;;  %v419_v51 = vpop.permute.xlu2 %418 }
  0x9f   : > { %935 = vmatmul.msk.f32.gmra.mxu2 %vm520_vm0, %v919_v38  ;;  %941 = vmatmul.msk.f32.gmra.mxu3 %vm520_vm0, %v925_v35  ;;  %vm457_vm14 = vcmp.eq.s32.totalorder %v419_v51, %v1341_v23  ;;  %v506_v35 = vld [vmem:[%s1315_s13 + $0x10] sm:$0xff]  ;;  %v651_v51 = vld [vmem:[#allocation2 + $0x8] sm:$0xff] }
  0xa0   : > { %v916_v52 = vsel %vm457_vm14, 1.0, %v1214_v25 }
  0xa4   : > { %v449_v39 = vpop.permute.xlu1 %448  ;;  %v434_v40 = vpop.permute.xlu0 %433 }
  0xa5   : > { %vm467_vm9 = vcmp.eq.s32.totalorder %v449_v39, %v1341_v23  ;;  %vm462_vm10 = vcmp.eq.s32.totalorder %v434_v40, %v1341_v23  ;;  %v637_v39 = vadd.s32 8, %v636_v34  ;;  %v1066_v40 = vld [vmem:[%s379_s9] ss:$0 sm:$0xff] }
  0xa6   : > { %v926_v42 = vsel %vm467_vm9, 1.0, %v1214_v25  ;;  %v921_v45 = vsel %vm462_vm10, 1.0, %v1214_v25  ;;  %vm640_vm2 = vcmp.eq.s32.totalorder %v1066_v40, %v636_v34 }
  0xa7   : > { %936 = vmatmul.msk.f32.gmra.mxu2 %vm520_vm0, %v920_v41  ;;  %942 = vmatmul.msk.f32.gmra.mxu3 %vm520_vm0, %v926_v42  ;;  %v504_v41 = vld [vmem:[%s1315_s13] sm:$0xff] }
  0xac   : > { %v452_v43 = vpop.permute.xlu1 %451  ;;  %v437_v44 = vpop.permute.xlu0 %436 }
  0xad   : > { %vm468_vm11 = vcmp.eq.s32.totalorder %v452_v43, %v1341_v23  ;;  %vm463_vm12 = vcmp.eq.s32.totalorder %v437_v44, %v1341_v23  ;;  %v1215_v43 = vmov 1.0   ;;  %v638_v44 = vadd.s32 16, %v636_v34 }
  0xae   : > { %v927_v46 = vsel %vm468_vm11, 1.0, %v1214_v25  ;;  %v922_v48 = vsel %vm463_vm12, 1.0, %v1214_v25 }
  0xaf   : > { %937 = vmatmul.msk.f32.gmra.mxu2 %vm520_vm0, %v921_v45  ;;  %943 = vmatmul.msk.f32.gmra.mxu3 %vm520_vm0, %v927_v46  ;;  %vm642_vm3 = vcmp.eq.s32.totalorder %v1066_v40, %v638_v44  ;;  %v649_v45 = vld [vmem:[#allocation2 + $0x10] sm:$0xff] }
  0xb4   : > { %v416_v47 = vpop.permute.xlu1 %415  ;;  %v440_v49 = vpop.permute.xlu0 %439 }
  0xb5   : > { %vm456_vm13 = vcmp.eq.s32.totalorder %v416_v47, %v1341_v23  ;;  %vm464_vm15 = vcmp.eq.s32.totalorder %v440_v49, %v1341_v23 }
  0xb6   : > { %v915_v50 = vsel %vm456_vm13, 1.0, %v1214_v25  ;;  %v923_v53 = vsel %vm464_vm15, 1.0, %v1214_v25 }
  0xb7   : > { %931 = vmatmul.msk.f32.gmra.mxu0 %vm520_vm0, %v915_v50  ;;  %938 = vmatmul.msk.f32.gmra.mxu2 %vm520_vm0, %v922_v48  ;;  %v650_v48 = vld [vmem:[#allocation2] sm:$0xff] }
  0xbc   : > { %v422_v54 = vpop.permute.xlu0 %421 }
  0xbd   : > { %vm458_vm1 = vcmp.eq.s32.totalorder %v422_v54, %v1341_v23  ;;  %v511_v23 = vld [vmem:[%s1315_s13 + $0x38] sm:$0xff] }
  0xbe   : > { %v917_v55 = vsel %vm458_vm1, 1.0, %v1214_v25  ;;  %v510_v25 = vld [vmem:[%s1315_s13 + $0x30] sm:$0xff] }
  0xbf   : > { %932 = vmatmul.msk.f32.gmra.mxu0 %vm520_vm0, %v916_v52  ;;  %939 = vmatmul.msk.f32.gmra.mxu2 %vm520_vm0, %v923_v53 }
  0xc7   : > { %933 = vmatmul.msk.f32.gmra.mxu0 %vm520_vm0, %v917_v55  ;;  %vm641_vm0 = vcmp.eq.s32.totalorder %v1066_v40, %v637_v39 }
 0x106   : > { %v1375_v58 = vpop.f32.mrf.mxu0 }
 0x107   : > { %v587_v22 = vadd.f32 %v1375_v58, %v504_v41 }
 0x10e   : > { %v1377_v61 = vpop.f32.mrf.mxu0 }
 0x10f   : > { %v590_v42 = vadd.f32 %v1377_v61, %v505_v37 }
 0x116   : > { %v592_v0 = vpop.f32.mrf.mxu0 }
 0x117   : > { %v593_v38 = vadd.f32 %v592_v0, %v506_v35 }
 0x11a   : > { %v604_v56 = vpop.f32.mrf.mxu2  ;;  %v622_v57 = vpop.f32.mrf.mxu3 }
 0x11b   : > { %v623_v11 = vadd.f32 %v622_v57, %v516_v8  ;;  %v605_v29 = vadd.f32 %v604_v56, %v510_v25 }
 0x122   : > { %v607_v59 = vpop.f32.mrf.mxu2  ;;  %v625_v60 = vpop.f32.mrf.mxu3 }
 0x123   : > { %v626_v9 = vadd.f32 %v625_v60, %v517_v6  ;;  %v608_v26 = vadd.f32 %v607_v59, %v511_v23 }
 0x12a   : > { %v610_v62 = vpop.f32.mrf.mxu2  ;;  %v628_v63 = vpop.f32.mrf.mxu3 }
 0x12b   : > { %v629_v7 = vadd.f32 %v628_v63, %v518_v2  ;;  %v611_v24 = vadd.f32 %v610_v62, %v512_v20 }
 0x132   : > { %v613_v3 = vpop.f32.mrf.mxu2  ;;  %v631_v4 = vpop.f32.mrf.mxu3 }
 0x133   : > { %v632_v5 = vadd.f32 %v631_v4, %v519_v1  ;;  %v614_v21 = vadd.f32 %v613_v3, %v513_v18 }
 0x134   : > { %v595_v10 = vpop.f32.mrf.mxu0 }
 0x135   : > { %652 = vmatpush.msra.mxu1 %v632_v5  ;;  %961 = vmatpush.msrb.mxu3 %v632_v5  ;;  %v596_v36 = vadd.f32 %v595_v10, %v507_v32 }
 0x137   : > { %653 = vmatpush.msra.mxu1 %v629_v7  ;;  %962 = vmatpush.msrb.mxu3 %v629_v7 }
 0x139   : > { %654 = vmatpush.msra.mxu1 %v626_v9  ;;  %963 = vmatpush.msrb.mxu3 %v626_v9 }
 0x13a   : > { %v616_v12 = vpop.f32.mrf.mxu2 }
 0x13b   : > { %655 = vmatpush.msra.mxu1 %v623_v11  ;;  %964 = vmatpush.msrb.mxu3 %v623_v11  ;;  %v617_v19 = vadd.f32 %v616_v12, %v514_v14 }
 0x13c   : > { %v598_v15 = vpop.f32.mrf.mxu0 }
 0x13d   : > { %v599_v33 = vadd.f32 %v598_v15, %v508_v30 }
 0x142   : > { %v619_v16 = vpop.f32.mrf.mxu2 }
 0x143   : > { %v620_v17 = vadd.f32 %v619_v16, %v515_v13 }
 0x144   : > { %v601_v28 = vpop.f32.mrf.mxu0 }
 0x145   : > { %656 = vmatpush.msra.mxu1 %v620_v17  ;;  %965 = vmatpush.msrb.mxu3 %v620_v17  ;;  %v602_v31 = vadd.f32 %v601_v28, %v509_v27 }
 0x147   : > { %657 = vmatpush.msra.mxu1 %v617_v19  ;;  %966 = vmatpush.msrb.mxu3 %v617_v19 }
 0x149   : > { %658 = vmatpush.msra.mxu1 %v614_v21  ;;  %967 = vmatpush.msrb.mxu3 %v614_v21 }
 0x14b   : > { %659 = vmatpush.msra.mxu1 %v611_v24  ;;  %968 = vmatpush.msrb.mxu3 %v611_v24 }
 0x14d   : > { %660 = vmatpush.msra.mxu1 %v608_v26  ;;  %969 = vmatpush.msrb.mxu3 %v608_v26 }
 0x14f   : > { %661 = vmatpush.msra.mxu1 %v605_v29  ;;  %970 = vmatpush.msrb.mxu3 %v605_v29 }
 0x151   : > { %662 = vmatpush.msra.mxu1 %v602_v31  ;;  %971 = vmatpush.msrb.mxu3 %v602_v31 }
 0x153   : > { %663 = vmatpush.msra.mxu1 %v599_v33  ;;  %972 = vmatpush.msrb.mxu3 %v599_v33 }
 0x155   : > { %664 = vmatpush.msra.mxu1 %v596_v36  ;;  %973 = vmatpush.msrb.mxu3 %v596_v36 }
 0x157   : > { %665 = vmatpush.msra.mxu1 %v593_v38  ;;  %974 = vmatpush.msrb.mxu3 %v593_v38 }
 0x159   : > { %666 = vmatpush.msra.mxu1 %v590_v42  ;;  %975 = vmatpush.msrb.mxu3 %v590_v42 }
 0x15b   : > { %667 = vmatpush.msra.mxu1 %v587_v22  ;;  %976 = vmatpush.msrb.mxu3 %v587_v22 }
 0x15c   : > { %948 = vmatmul.msk.f32.vlgmr.msrb.gmra.mxu3 %vm641_vm0, %v1215_v43  ;;  %947 = vmatmul.msk.f32.vlgmr.msra.gmra.mxu1 %vm640_vm2, %v1215_v43 }
 0x164   : > { %949 = vmatmul.msk.f32.gmra.mxu3 %vm642_vm3, %v1215_v43 }
 0x1d9   : > { %v669_v46 = vpop.f32.mrf.mxu1 }
 0x1da   : > { %v678_v47 = vadd.f32 %v669_v46, %v649_v45 }
 0x1dc   : > { %681 = vst [vmem:[#allocation2 + $0x10] sm:$0xff] %v678_v47 }
 0x1df   : > { %v672_v49 = vpop.f32.mrf.mxu3 }
 0x1e0   : > { %v679_v50 = vadd.f32 %v672_v49, %v650_v48 }
 0x1e2   : > { %682 = vst [vmem:[#allocation2] sm:$0xff] %v679_v50 }
 0x1e6   : > { %687 = sbr.rel (%p950_p9) target bundleno = 802 (0x322), region = 72 }
 0x1e7   : > { %v675_v52 = vpop.f32.mrf.mxu3 }
 0x1e8   : > { %v680_v53 = vadd.f32 %v675_v52, %v651_v51 }
 0x1ea   : > { %683 = vst [vmem:[#allocation2 + $0x8] sm:$0xff] %v680_v53 }
 0x1eb   : > { %v712_v54 = vld [vmem:[#allocation6 + $0x78] sm:$0xff]  ;;  %v711_v55 = vld [vmem:[#allocation6 + $0x70] sm:$0xff]  ;;  %v710_v56 = vld [vmem:[#allocation6 + $0x68] sm:$0xff] }
 0x1ec   : > { %977 = vmatpush.msra.mxu2 %v712_v54  ;;  %717 = vmatpush.msra.mxu0 %v712_v54  ;;  %v709_v57 = vld [vmem:[#allocation6 + $0x60] sm:$0xff]  ;;  %v708_v58 = vld [vmem:[#allocation6 + $0x58] sm:$0xff]  ;;  %v707_v59 = vld [vmem:[#allocation6 + $0x50] sm:$0xff] }
 0x1ed   : > { %v761_v60 = vld [vmem:[#allocation8 + $0x78] sm:$0xff]  ;;  %v760_v61 = vld [vmem:[#allocation8 + $0x70] sm:$0xff]  ;;  %v706_v62 = vld [vmem:[#allocation6 + $0x48] sm:$0xff] }
 0x1ee   : > { %978 = vmatpush.msra.mxu2 %v711_v55  ;;  %718 = vmatpush.msra.mxu0 %v711_v55  ;;  %v759_v63 = vld [vmem:[#allocation8 + $0x68] sm:$0xff]  ;;  %v705_v0 = vld [vmem:[#allocation6 + $0x40] sm:$0xff]  ;;  %v704_v2 = vld [vmem:[#allocation6 + $0x38] sm:$0xff] }
 0x1ef   : > { %993 = vmatpush.msra.mxu3 %v761_v60  ;;  %766 = vmatpush.msra.mxu1 %v761_v60  ;;  %v758_v1 = vld [vmem:[#allocation8 + $0x60] sm:$0xff]  ;;  %v757_v3 = vld [vmem:[#allocation8 + $0x58] sm:$0xff]  ;;  %v703_v4 = vld [vmem:[#allocation6 + $0x30] sm:$0xff] }
 0x1f0   : > { %979 = vmatpush.msra.mxu2 %v710_v56  ;;  %719 = vmatpush.msra.mxu0 %v710_v56  ;;  %v756_v5 = vld [vmem:[#allocation8 + $0x50] sm:$0xff]  ;;  %v702_v6 = vld [vmem:[#allocation6 + $0x28] sm:$0xff]  ;;  %v701_v8 = vld [vmem:[#allocation6 + $0x20] sm:$0xff] }
 0x1f1   : > { %994 = vmatpush.msra.mxu3 %v760_v61  ;;  %767 = vmatpush.msra.mxu1 %v760_v61  ;;  %v755_v7 = vld [vmem:[#allocation8 + $0x48] sm:$0xff]  ;;  %v754_v9 = vld [vmem:[#allocation8 + $0x40] sm:$0xff]  ;;  %v700_v10 = vld [vmem:[#allocation6 + $0x18] sm:$0xff] }
 0x1f2   : > { %980 = vmatpush.msra.mxu2 %v709_v57  ;;  %720 = vmatpush.msra.mxu0 %v709_v57  ;;  %v753_v11 = vld [vmem:[#allocation8 + $0x38] sm:$0xff]  ;;  %v699_v12 = vld [vmem:[#allocation6 + $0x10] sm:$0xff]  ;;  %v688_v15 = vld [vmem:[#allocation3] sm:$0xff] }
 0x1f3   : > { %995 = vmatpush.msra.mxu3 %v759_v63  ;;  %768 = vmatpush.msra.mxu1 %v759_v63  ;;  %v689_v13 = vld [vmem:[#allocation3 + $0x8] sm:$0xff]  ;;  %v691_v16 = vld [vmem:[#allocation2 + $0x10] sm:$0xff]  ;;  %v698_v18 = vld [vmem:[#allocation6 + $0x8] sm:$0xff] }
 0x1f4   : > { %981 = vmatpush.msra.mxu2 %v708_v58  ;;  %721 = vmatpush.msra.mxu0 %v708_v58  ;;  %v692_v14 = vld [vmem:[#allocation2] sm:$0xff]  ;;  %v751_v19 = vld [vmem:[#allocation8 + $0x28] sm:$0xff]  ;;  %v697_v20 = vld [vmem:[#allocation6] sm:$0xff]  ;;  %v694_v23 = vadd.f32 %v691_v16, %v688_v15 }
 0x1f5   : > { %996 = vmatpush.msra.mxu3 %v758_v1  ;;  %769 = vmatpush.msra.mxu1 %v758_v1  ;;  %v752_v17 = vld [vmem:[#allocation8 + $0x30] sm:$0xff]  ;;  %v695_v21 = vadd.f32 %v692_v14, %v689_v13  ;;  %v750_v24 = vld [vmem:[#allocation8 + $0x20] sm:$0xff]  ;;  %v749_v25 = vld [vmem:[#allocation8 + $0x18] sm:$0xff] }
 0x1f6   : > { %982 = vmatpush.msra.mxu2 %v707_v59  ;;  %722 = vmatpush.msra.mxu0 %v707_v59  ;;  %v690_v26 = vld [vmem:[#allocation3 + $0x10] sm:$0xff]  ;;  %v748_v29 = vld [vmem:[#allocation8 + $0x10] sm:$0xff]  ;;  %v747_v30 = vld [vmem:[#allocation8 + $0x8] sm:$0xff] }
 0x1f7   : > { %997 = vmatpush.msra.mxu3 %v757_v3  ;;  %770 = vmatpush.msra.mxu1 %v757_v3  ;;  %v693_v27 = vld [vmem:[#allocation2 + $0x8] sm:$0xff]  ;;  %v746_v31 = vld [vmem:[#allocation8] sm:$0xff]  ;;  %v1067_v32 = vld [vmem:[%s1422_s5] ss:$0 sm:$0xff] }
 0x1f8   : > { %983 = vmatpush.msra.mxu2 %v706_v62  ;;  %723 = vmatpush.msra.mxu0 %v706_v62  ;;  %v696_v28 = vadd.f32 %v693_v27, %v690_v26  ;;  %v1068_v42 = vld [vmem:[%s1424_s7] ss:$0 sm:$0xff] }
 0x1f9   : > { %998 = vmatpush.msra.mxu3 %v756_v5  ;;  %771 = vmatpush.msra.mxu1 %v756_v5 }
 0x1fa   : > { %984 = vmatpush.msra.mxu2 %v705_v0  ;;  %724 = vmatpush.msra.mxu0 %v705_v0 }
 0x1fb   : > { %999 = vmatpush.msra.mxu3 %v755_v7  ;;  %772 = vmatpush.msra.mxu1 %v755_v7 }
 0x1fc   : > { %985 = vmatpush.msra.mxu2 %v704_v2  ;;  %725 = vmatpush.msra.mxu0 %v704_v2 }
 0x1fd   : > { %1000 = vmatpush.msra.mxu3 %v754_v9  ;;  %773 = vmatpush.msra.mxu1 %v754_v9 }
 0x1fe   : > { %986 = vmatpush.msra.mxu2 %v703_v4  ;;  %726 = vmatpush.msra.mxu0 %v703_v4 }
 0x1ff   : > { %1001 = vmatpush.msra.mxu3 %v753_v11  ;;  %774 = vmatpush.msra.mxu1 %v753_v11 }
 0x200   : > { %987 = vmatpush.msra.mxu2 %v702_v6  ;;  %727 = vmatpush.msra.mxu0 %v702_v6 }
 0x201   : > { %1002 = vmatpush.msra.mxu3 %v752_v17  ;;  %775 = vmatpush.msra.mxu1 %v752_v17 }
 0x202   : > { %988 = vmatpush.msra.mxu2 %v701_v8  ;;  %728 = vmatpush.msra.mxu0 %v701_v8 }
 0x203   : > { %1003 = vmatpush.msra.mxu3 %v751_v19  ;;  %776 = vmatpush.msra.mxu1 %v751_v19 }
 0x204   : > { %989 = vmatpush.msra.mxu2 %v700_v10  ;;  %729 = vmatpush.msra.mxu0 %v700_v10 }
 0x205   : > { %1004 = vmatpush.msra.mxu3 %v750_v24  ;;  %777 = vmatpush.msra.mxu1 %v750_v24 }
 0x206   : > { %990 = vmatpush.msra.mxu2 %v699_v12  ;;  %730 = vmatpush.msra.mxu0 %v699_v12 }
 0x207   : > { %1005 = vmatpush.msra.mxu3 %v749_v25  ;;  %778 = vmatpush.msra.mxu1 %v749_v25 }
 0x208   : > { %991 = vmatpush.msra.mxu2 %v698_v18  ;;  %731 = vmatpush.msra.mxu0 %v698_v18 }
 0x209   : > { %1006 = vmatpush.msra.mxu3 %v748_v29  ;;  %779 = vmatpush.msra.mxu1 %v748_v29 }
 0x20a   : > { %992 = vmatpush.msra.mxu2 %v697_v20  ;;  %732 = vmatpush.msra.mxu0 %v697_v20 }
 0x20b   : > { %736 = vmatmul.f32.vlgmr.msra.gmra.mxu2 %v695_v21  ;;  %733 = vmatmul.f32.vlgmr.msra.gmra.mxu0 %v694_v23 }
 0x20c   : > { %1007 = vmatpush.msra.mxu3 %v747_v30  ;;  %780 = vmatpush.msra.mxu1 %v747_v30 }
 0x20e   : > { %1008 = vmatpush.msra.mxu3 %v746_v31  ;;  %781 = vmatpush.msra.mxu1 %v746_v31 }
 0x213   : > { %739 = vmatmul.f32.gmra.mxu2 %v696_v28 }
 0x288   : > { %v734_v33 = vpop.f32.mrf.mxu0 }
 0x289   : > { %v735_v34 = vadd.f32 %v1067_v32, %v734_v33 }
 0x28b   : > { %v743_v35 = vmax.f32 %v735_v34, 0.0 }
 0x28d   : > { %782 = vmatmul.f32.vlgmr.msra.gmra.mxu1 %v743_v35 }
 0x28e   : > { %v737_v36 = vpop.f32.mrf.mxu2 }
 0x28f   : > { %v738_v37 = vadd.f32 %v1067_v32, %v737_v36 }
 0x291   : > { %v744_v38 = vmax.f32 %v738_v37, 0.0 }
 0x293   : > { %785 = vmatmul.f32.vlgmr.msra.gmra.mxu3 %v744_v38 }
 0x296   : > { %v740_v39 = vpop.f32.mrf.mxu2 }
 0x297   : > { %v741_v40 = vadd.f32 %v1067_v32, %v740_v39 }
 0x299   : > { %v745_v41 = vmax.f32 %v741_v40, 0.0 }
 0x29b   : > { %788 = vmatmul.f32.gmra.mxu3 %v745_v41 }
 0x30a   : > { %v783_v22 = vpop.f32.mrf.mxu1 }
 0x30b   : > { %v784_v43 = vadd.f32 %v1068_v42, %v783_v22 }
 0x30d   : > { %792 = vst [vmem:[#allocation9] sm:$0xff] %v784_v43 }
 0x316   : > { %v786_v44 = vpop.f32.mrf.mxu3 }
 0x317   : > { %v787_v45 = vadd.f32 %v1068_v42, %v786_v44 }
 0x319   : > { %793 = vst [vmem:[#allocation9 + $0x8] sm:$0xff] %v787_v45 }
 0x31e   : > { %v789_v46 = vpop.f32.mrf.mxu3 }
 0x31f   : > { %v790_v47 = vadd.f32 %v1068_v42, %v789_v46 }
 0x321   : > { %794 = vst [vmem:[#allocation9 + $0x10] sm:$0xff] %v790_v47 }
 0x322 PF: > { %p1041_p10 = scmp.eq.s32.totalorder %s1270_s28, 1  ;;  %s1216_s23 = smov [#allocation9]  }
 0x323   : > { %s800_s24 = sshll.u32 %s1216_s23, 4  ;;  %s802_s29 = sshll.u32 %s1425_s8, 4  ;;  %s801_s24 = int_to_ptr.vmem [resolvable:$true] %s800_s24  ;;  %s803_s29 = int_to_ptr.hbm [resolvable:$true] %s802_s29 }
 0x324   : > { %s1217_s30 = smov 128   ;;  %s1218_s9 = smov 8  }
 0x325   : > { %1022 = dma.vmem_to_hbm [thread:$0]  (%p1041_p10), %s801_s24, 384, %s803_s29, [#allocation5], %s1217_s30, %s1217_s30, %s1218_s9  }
 0x326   : > { %1200 = dma.done.wait (%p1041_p10), [#allocation5], 384  }
 0x327   : > { %1202 = vsyncadd (%p1041_p10), [#allocation5], 4294966912 }
 0x328 PF: > { %s21_s27 = sadd.s32 1, %s1205_s27  }
 0x329   : > { %p18_p11 = scmp.ge.s32.totalorder %s21_s27, 4  }
 0x32b   :  { %20 = sbr.rel (!%p18_p11) target bundleno = 3 (0x3), region = 106 }
 0x330   :  { %819 = vsyncpa [#allocation4], 1 }
 0x331   :  { %821 = vsyncpa [#allocation4 + $0x1], 1 }
 0x332   :  { %822 = vsyncpa [#allocation7], 1 }
 0x333   :  { %823 = vsyncpa [#allocation5], 1 }
 0x334   :  { %825 = vsyncpa [#allocation5 + $0x1], 1 }

</bundles_post_ra>
